<compile_context>
chip_gen: v7x
topology: tpu7x:2x2x1
jax: 0.10.0
libtpu: 0.0.40
codegen_flags: <defaults>
</compile_context>

<pallas_src>
import jax
import jax.numpy as jnp
from jax.experimental import pallas as pl
from jax.experimental.pallas import tpu as pltpu

EPS = 1e-15


def _env_loss_kernel(ids_ref, coef_ref, zt_ref, out_ref):
    """One edge tile: gather -> dot -> sigmoid -> log -> weighted partial sum."""
    block_e = ids_ref.shape[1]          # edges per tile (multiple of 128)
    n_nodes = zt_ref.shape[1]

    ids = ids_ref[...]                  # (2, block_e) int32: row0 = src, row1 = dst
    zt = zt_ref[...]                    # (D, N) float32 (resident every step)

    # One-hot "gather" on the MXU.  Stack src/dst one-hots into a single LHS
    # so there is one matmul per tile: (D, N) @ (N, 2*block_e) -> (D, 2*block_e).
    node_iota = jax.lax.broadcasted_iota(jnp.int32, (n_nodes, block_e), 0)
    src_oh = (ids[0:1, :] == node_iota).astype(jnp.float32)     # (N, block_e)
    dst_oh = (ids[1:2, :] == node_iota).astype(jnp.float32)     # (N, block_e)
    oh = jnp.concatenate([src_oh, dst_oh], axis=1)              # (N, 2*block_e)

    g = jnp.dot(zt, oh,
                preferred_element_type=jnp.float32,
                precision=jax.lax.Precision.HIGHEST)            # (D, 2*block_e)
    z_src = g[:, :block_e]                                      # (D, block_e)
    z_dst = g[:, block_e:]                                      # (D, block_e)

    # Per-edge inner product; edges stay on lanes (lane-dense epilogue).
    v = jnp.sum(z_src * z_dst, axis=0, keepdims=True)           # (1, block_e)

    # Numerically stable sigmoid (no exp overflow for large |v|).
    e = jnp.exp(-jnp.abs(v))
    sig = jnp.where(v >= 0, 1.0 / (1.0 + e), e / (1.0 + e))     # (1, block_e)

    is_pos = coef_ref[0:1, :]                                   # (1, block_e) 1.0/0.0
    weight = coef_ref[1:2, :]                                   # (1, block_e) 1/n or 0

    p = jnp.where(is_pos > 0.5, sig, 1.0 - sig)                 # matches torch forms
    term = -jnp.log(p + EPS)                                    # (1, block_e)

    # Weighted partial sum for this tile; padded edges carry weight 0.
    partial = jnp.sum(weight * term, axis=1, keepdims=True)     # (1, 1)

    # Each tile owns its own output block (no carried accumulator state).
    out_ref[...] = jnp.broadcast_to(partial, (1, 8, 128))


def env_loss(z, pos_edge_index, neg_edge_index, *, block_e=1024):
    """EnvLoss.forward: -log(dec(pos)+EPS).mean() - log(1-dec(neg)+EPS).mean()."""
    n, d = z.shape
    num_pos = int(pos_edge_index.shape[1])
    num_neg = int(neg_edge_index.shape[1])
    total = num_pos + num_neg
    num_tiles = max(1, pl.cdiv(total, block_e))
    e_pad = num_tiles * block_e

    # Pack edge ids lane-dense: (2, E_pad) int32 (row0 = src, row1 = dst).
    src = jnp.concatenate([pos_edge_index[0], neg_edge_index[0]]).astype(jnp.int32)
    dst = jnp.concatenate([pos_edge_index[1], neg_edge_index[1]]).astype(jnp.int32)
    ids = jnp.zeros((2, e_pad), jnp.int32)
    ids = ids.at[0, :total].set(src).at[1, :total].set(dst)

    # Per-edge coefficients: row0 = is_pos flag, row1 = mean weight (0 for pad).
    is_pos = jnp.concatenate([jnp.ones((num_pos,), jnp.float32),
                              jnp.zeros((num_neg,), jnp.float32)])
    weight = jnp.concatenate([jnp.full((num_pos,), 1.0 / num_pos, jnp.float32),
                              jnp.full((num_neg,), 1.0 / num_neg, jnp.float32)])
    coef = jnp.zeros((2, e_pad), jnp.float32)
    coef = coef.at[0, :total].set(is_pos).at[1, :total].set(weight)

    # Transposed embeddings so the edge axis of the gather lands on lanes.
    zt = z.astype(jnp.float32).T                                # (D, N)

    out = pl.pallas_call(
        _env_loss_kernel,
        out_shape=jax.ShapeDtypeStruct((num_tiles, 8, 128), jnp.float32),
        grid_spec=pltpu.PrefetchScalarGridSpec(
            num_scalar_prefetch=0,
            grid=(num_tiles,),
            in_specs=[
                pl.BlockSpec((2, block_e), lambda i: (0, i)),   # edge ids
                pl.BlockSpec((2, block_e), lambda i: (0, i)),   # flags / weights
                pl.BlockSpec((d, n), lambda i: (0, 0)),         # z^T, resident
            ],
            out_specs=pl.BlockSpec((1, 8, 128), lambda i: (i, 0, 0)),
        ),
        compiler_params=pltpu.CompilerParams(
            # Tiles are independent (no carried state) -> parallel axis
            # (v7x megacore can shard it; no-op on v5e/v6e).
            dimension_semantics=("parallel",),
            # Above the 16/32 MiB scoped defaults, within v7x's 64 MiB.
            vmem_limit_bytes=64 * 1024 * 1024,
        ),
    )(ids, coef, zt)

    # Every entry of a tile's block holds that tile's partial sum.
    return jnp.sum(out[:, 0, 0])


def _env_loss_ref(z, pos_edge_index, neg_edge_index):
    """Pure-JAX reference matching the PyTorch semantics."""
    def dec(ei):
        v = jnp.sum(z[ei[0]] * z[ei[1]], axis=1)
        return jax.nn.sigmoid(v)
    pos_loss = -jnp.mean(jnp.log(dec(pos_edge_index) + EPS))
    neg_loss = -jnp.mean(jnp.log(1.0 - dec(neg_edge_index) + EPS))
    return pos_loss + neg_loss


if __name__ == "__main__":
    key = jax.random.PRNGKey(0)
    k_z, k_pos, k_neg = jax.random.split(key, 3)

    num_nodes, dim = 32, 16
    num_pos_edges, num_neg_edges = 200, 200

    z = jax.random.normal(k_z, (num_nodes, dim), dtype=jnp.float32)
    pos_edge_index = jax.random.randint(
        k_pos, (2, num_pos_edges), 0, num_nodes, dtype=jnp.int32)
    neg_edge_index = jax.random.randint(
        k_neg, (2, num_neg_edges), 0, num_nodes, dtype=jnp.int32)

    # Small block_e here so the demo exercises the multi-tile path
    # (2 tiles for 400 edges); use the 512-2048 default for real sizes.
    loss = env_loss(z, pos_edge_index, neg_edge_index, block_e=256)
    loss = jax.block_until_ready(loss)

    ref = _env_loss_ref(z, pos_edge_index, neg_edge_index)
    assert bool(jnp.isfinite(loss)), loss
    assert jnp.allclose(loss, ref, rtol=1e-4, atol=1e-4), (loss, ref)

    print("KERNEL_OK")
</pallas_src>

<mosaic_0001>
module attributes {stable_mosaic.version = 11 : i64} {
  func.func @_env_loss_kernel(%arg0: i32, %arg1: memref<2x256xi32, #tpu.memory_space<vmem>>, %arg2: memref<2x256xf32, #tpu.memory_space<vmem>>, %arg3: memref<16x32xf32, #tpu.memory_space<vmem>>, %arg4: memref<1x8x128xf32, #tpu.memory_space<vmem>>) attributes {dimension_semantics = [#tpu.dimension_semantics<parallel>], iteration_bounds = array<i64: 2>, scalar_prefetch = 0 : i64, scratch_operands = 0 : i64, tpu.core_type = #tpu.core_type<tc>, window_params = [{transform_indices = @transform_0, window_bounds = array<i64: 2, 256>}, {transform_indices = @transform_1, window_bounds = array<i64: 2, 256>}, {pipeline_mode = #tpu.pipeline_mode<synchronous>, transform_indices = @transform_2, window_bounds = array<i64: 16, 32>}, {transform_indices = @transform_3, window_bounds = array<i64: 1, 8, 128>}]} {
    %c0 = arith.constant 0 : index
    %c0_0 = arith.constant 0 : index
    %0 = vector.load %arg1[%c0, %c0_0] : memref<2x256xi32, #tpu.memory_space<vmem>>, vector<2x256xi32>
    %c0_1 = arith.constant 0 : index
    %c0_2 = arith.constant 0 : index
    %1 = vector.load %arg3[%c0_1, %c0_2] : memref<16x32xf32, #tpu.memory_space<vmem>>, vector<16x32xf32>
    %2 = tpu.iota {dimensions = array<i32: 0>} : vector<32x256xi32>
    %3 = vector.extract_strided_slice %0 {offsets = [0, 0], sizes = [1, 256], strides = [1, 1]} : vector<2x256xi32> to vector<1x256xi32>
    %4 = vector.broadcast %3 : vector<1x256xi32> to vector<32x256xi32>
    %5 = arith.cmpi eq, %4, %2 : vector<32x256xi32>
    %6 = arith.extui %5 : vector<32x256xi1> to vector<32x256xi32>
    %7 = arith.sitofp %6 : vector<32x256xi32> to vector<32x256xf32>
    %8 = vector.extract_strided_slice %0 {offsets = [1, 0], sizes = [1, 256], strides = [1, 1]} : vector<2x256xi32> to vector<1x256xi32>
    %9 = vector.broadcast %8 : vector<1x256xi32> to vector<32x256xi32>
    %10 = arith.cmpi eq, %9, %2 : vector<32x256xi32>
    %11 = arith.extui %10 : vector<32x256xi1> to vector<32x256xi32>
    %12 = arith.sitofp %11 : vector<32x256xi32> to vector<32x256xf32>
    %13 = tpu.concatenate %7, %12 in 1 : vector<32x256xf32>, vector<32x256xf32> -> vector<32x512xf32>
    %cst = arith.constant dense<0.000000e+00> : vector<16x512xf32>
    %14 = tpu.matmul %1, %13, %cst {dimension_numbers = #tpu.dot_dimension_numbers<[1], [0], [0], [1], [0, 0, 1, 1], [], []>, precision = #tpu.contract_precision<fp32>} : vector<16x32xf32>, vector<32x512xf32>, vector<16x512xf32> -> vector<16x512xf32>
    %15 = vector.extract_strided_slice %14 {offsets = [0, 0], sizes = [16, 256], strides = [1, 1]} : vector<16x512xf32> to vector<16x256xf32>
    %16 = vector.extract_strided_slice %14 {offsets = [0, 256], sizes = [16, 256], strides = [1, 1]} : vector<16x512xf32> to vector<16x256xf32>
    %17 = arith.mulf %15, %16 : vector<16x256xf32>
    %cst_3 = arith.constant dense<0.000000e+00> : vector<256xf32>
    %18 = vector.multi_reduction <add>, %17, %cst_3 [0] : vector<16x256xf32> to vector<256xf32>
    %19 = vector.shape_cast %18 : vector<256xf32> to vector<1x256xf32>
    %20 = math.absf %19 : vector<1x256xf32>
    %cst_4 = arith.constant 0.000000e+00 : f32
    %21 = vector.broadcast %cst_4 : f32 to vector<1x256xf32>
    %22 = arith.subf %21, %20 : vector<1x256xf32>
    %23 = math.exp %22 : vector<1x256xf32>
    %cst_5 = arith.constant 0.000000e+00 : f32
    %24 = vector.broadcast %cst_5 : f32 to vector<1x256xf32>
    %25 = arith.cmpf oge, %19, %24 : vector<1x256xf32>
    %cst_6 = arith.constant 1.000000e+00 : f32
    %26 = vector.broadcast %cst_6 : f32 to vector<1x256xf32>
    %27 = arith.addf %26, %23 : vector<1x256xf32>
    %cst_7 = arith.constant 1.000000e+00 : f32
    %28 = vector.broadcast %cst_7 : f32 to vector<1x256xf32>
    %29 = arith.divf %28, %27 : vector<1x256xf32>
    %cst_8 = arith.constant 1.000000e+00 : f32
    %30 = vector.broadcast %cst_8 : f32 to vector<1x256xf32>
    %31 = arith.addf %30, %23 : vector<1x256xf32>
    %32 = arith.divf %23, %31 : vector<1x256xf32>
    %33 = arith.select %25, %29, %32 : vector<1x256xi1>, vector<1x256xf32>
    %c0_9 = arith.constant 0 : index
    %c0_10 = arith.constant 0 : index
    %34 = vector.load %arg2[%c0_9, %c0_10] : memref<2x256xf32, #tpu.memory_space<vmem>>, vector<1x256xf32>
    %c1 = arith.constant 1 : index
    %c0_11 = arith.constant 0 : index
    %35 = vector.load %arg2[%c1, %c0_11] : memref<2x256xf32, #tpu.memory_space<vmem>>, vector<1x256xf32>
    %cst_12 = arith.constant 5.000000e-01 : f32
    %36 = vector.broadcast %cst_12 : f32 to vector<1x256xf32>
    %37 = arith.cmpf ogt, %34, %36 : vector<1x256xf32>
    %cst_13 = arith.constant 1.000000e+00 : f32
    %38 = vector.broadcast %cst_13 : f32 to vector<1x256xf32>
    %39 = arith.subf %38, %33 : vector<1x256xf32>
    %40 = arith.select %37, %33, %39 : vector<1x256xi1>, vector<1x256xf32>
    %cst_14 = arith.constant 1.000000e-15 : f32
    %41 = vector.broadcast %cst_14 : f32 to vector<1x256xf32>
    %42 = arith.addf %40, %41 : vector<1x256xf32>
    %43 = math.log %42 : vector<1x256xf32>
    %cst_15 = arith.constant 0.000000e+00 : f32
    %44 = vector.broadcast %cst_15 : f32 to vector<1x256xf32>
    %45 = arith.subf %44, %43 : vector<1x256xf32>
    %46 = arith.mulf %35, %45 : vector<1x256xf32>
    %cst_16 = arith.constant dense<0.000000e+00> : vector<1xf32>
    %47 = vector.multi_reduction <add>, %46, %cst_16 [1] : vector<1x256xf32> to vector<1xf32>
    %48 = vector.shape_cast %47 : vector<1xf32> to vector<1x1xf32>
    %49 = vector.shape_cast %48 : vector<1x1xf32> to vector<1x1x1xf32>
    %50 = vector.broadcast %49 : vector<1x1x1xf32> to vector<1x8x128xf32>
    %c0_17 = arith.constant 0 : index
    %c0_18 = arith.constant 0 : index
    %c0_19 = arith.constant 0 : index
    %51 = vector.load %arg4[%c0_17, %c0_18, %c0_19] : memref<1x8x128xf32, #tpu.memory_space<vmem>>, vector<1x8x128xf32>
    tpu.vector_store %arg4[%c0_17, %c0_18, %c0_19], %50 {strides = array<i32>} : memref<1x8x128xf32, #tpu.memory_space<vmem>>, vector<1x8x128xf32>,
    return
  }
  func.func @transform_0(%arg0: i32) -> (i32, i32) {
    %c0_i32 = arith.constant 0 : i32
    %c0_i32_0 = arith.constant 0 : i32
    return %c0_i32, %arg0 : i32, i32
  }
  func.func @transform_1(%arg0: i32) -> (i32, i32) {
    %c0_i32 = arith.constant 0 : i32
    %c0_i32_0 = arith.constant 0 : i32
    return %c0_i32, %arg0 : i32, i32
  }
  func.func @transform_2(%arg0: i32) -> (i32, i32) {
    %c0_i32 = arith.constant 0 : i32
    %c0_i32_0 = arith.constant 0 : i32
    %c0_i32_1 = arith.constant 0 : i32
    return %c0_i32, %c0_i32_0 : i32, i32
  }
  func.func @transform_3(%arg0: i32) -> (i32, i32, i32) {
    %c0_i32 = arith.constant 0 : i32
    %c0_i32_0 = arith.constant 0 : i32
    %c0_i32_1 = arith.constant 0 : i32
    return %arg0, %c0_i32, %c0_i32_0 : i32, i32, i32
  }
}

</mosaic_0001>

<bundles_post_ra>
// kernel: tpu_custom_call.1
= control target key start
LH: loop header
LB: loop body
LE: loop exit
PB: predicated region body
PF: predicated region fallthrough
CT: control target
= control target key end

     0   :  { %8 = vsyncpa [#allocation3], 0  ;;  %s2858_s0 = inlined_call_operand.hbm [shape: s32[2,512], index: 0, kind: input, shape index: {}]   ;;  %s2859_s1 = inlined_call_operand.hbm [shape: f32[2,512], index: 1, kind: input, shape index: {}]   ;;  %s2860_s2 = inlined_call_operand.hbm [shape: f32[16,32], index: 2, kind: input, shape index: {}]   ;;  %s2861_s3 = inlined_call_operand.hbm [shape: f32[2,8,128], index: 3, kind: output, shape index: {}]  }
   0x1   :  { %10 = vsyncpa [#allocation3 + $0x1], 0 }
   0x2   :  { %11 = vsyncpa [#allocation6], 0 }
   0x3   :  { %13 = vsyncpa [#allocation6 + $0x1], 0 }
   0x4   :  { %14 = vsyncpa [#allocation4], 0 }
   0x5   :  { %16 = vsyncpa [#allocation4 + $0x1], 0  ;;  %s2236_s12 = smov 0   ;;  %s2238_s13 = smov 0  }
   0x6   :  { %s2240_s14 = smov 0   ;;  %s2242_s15 = smov 0  }
   0x7 LB: > { %s2257_s16 = sadd.s32 4294967295, %s2205_s15   ;;  %s1744_s17 = sadd.s32 4294967294, %s2205_s15   ;;  %s2205_s15 = sphi %s2242_s15, %s2913_s15   ;;  %s2201_s14 = sphi %s2240_s14, %s2912_s14   ;;  %s2197_s13 = sphi %s2238_s13, %s2911_s13   ;;  %s2193_s12 = sphi %s2236_s12, %s2910_s12  }
   0x8   : > { %p42_p0 = scmp.ne.s32.totalorder %s2197_s13, %s2193_s12  ;;  %p2862_p1 = scmp.eq.s32.totalorder %s2257_s16, 0 }
   0x9   : > { %p119_p3 = scmp.eq.s32.totalorder %s1744_s17, 1  ;;  %p1745_p5 = scmp.ge.s32.totalorder %s2205_s15, 1 }
   0xa   : > { %p2266_p4 = por %p2862_p1, %p42_p0  ;;  %p126_p7 = scmp.lt.s32.totalorder %s2205_s15, 3 }
   0xb   : > { %p2271_p6 = por %p119_p3, %p42_p0  ;;  %s2207_s21 = smov [#allocation7]  }
   0xc   : > { %s2873_s18 = scalar_select %p2266_p4, 1, 0 }
   0xd   : > { %s2874_s19 = scalar_select %p2271_p6, 1, 0 }
   0xe   : > { %p2276_p8 = pnand %p1745_p5, %p126_p7  ;;  %s138_s22 = sshll.u32 %s2207_s21, 4  ;;  %s2280_s22 = int_to_ptr.vmem [resolvable:$true] %s138_s22 }
   0xf   : > { %s2292_s24 = sadd.s32 1, %s2205_s15   ;;  %s29_s25 = sadd.s32 1, %s2201_s14 }
  0x10   : > { %s2875_s20 = scalar_select %p2276_p8, 1, 0 }
  0x11   : > { %p1976_p9 = pneg %p2276_p8  ;;  %s26_s26 = ssub.s32 %s2205_s15, %s2292_s24 }
  0x12   : > { %s2043_s29 = scalar_lea.hbm %s2860_s2, 256 }
  0x13   : > { %p2287_p11 = pnand %p1976_p9, %p2862_p1  ;;  %p2044_p12 = scmp.ne.s32.totalorder %s2860_s2, %s2043_s29 }
  0x14   : > { %p2050_p5 = scmp.lt.u32.totalorder %s2043_s29, %s2860_s2 }
  0x15   : > { %p2045_p13 = pneg %p2287_p11 }
  0x17   : > { %p2046_p0 = pnand %p2045_p13, %p2044_p12 }
  0x19   : > { %p2047_p3 = pneg %p2046_p0 }
  0x1b   : > { %p2052_p7 = pnand %p2050_p5, %p2047_p3 }
  0x1d   : > { %2055 = shalt.err (!%p2052_p7)
}
  0x1e   : > { %s2056_s7 = scalar_lea.vmem %s2280_s22, 256  ;;  %p2064_p2 = scmp.lt.s32.totalorder %s2280_s22, %s2280_s22 }
  0x1f   : > { %p2057_p9 = scmp.ne.s32.totalorder %s2280_s22, %s2056_s7  ;;  %p2065_p6 = scmp.lt.s32.totalorder %s2056_s7, %s2056_s7 }
  0x21   : > { %p2059_p10 = pnand %p2057_p9, %p2045_p13  ;;  %p2066_p4 = por %p2065_p6, %p2064_p2 }
  0x23   : > { %p2060_p1 = pneg %p2059_p10 }
  0x25   : > { %p2067_p8 = pnand %p2066_p4, %p2060_p1 }
  0x27   : > { %2070 = shalt.err (!%p2067_p8)
}
  0x28   : > { %s2208_s8 = smov 128   ;;  %s2209_s9 = smov 8  }
  0x29   : > { %1979 = dma.hbm_to_vmem [thread:$0]  (!%p2287_p11), %s2860_s2, 256, %s2280_s22, [#allocation6], %s2208_s8, %s2208_s8, %s2209_s9  }
  0x2a   : > { %p27_p2 = scmp.eq.s32.totalorder %s26_s26, 0  ;;  %p36_p1 = scmp.ne.s32.totalorder %s2201_s14, %s2197_s13 }
  0x2b   : > { %p37_p4 = scmp.eq.s32.totalorder %s2205_s15, 0  ;;  %p1992_p6 = scmp.lt.s32.totalorder %s2205_s15, 2 }
  0x2c   : > { %s2323_s17 = scalar_select %p27_p2, %s2201_s14, %s29_s25  }
  0x2d   : > { %p38_p8 = por %p37_p4, %p36_p1  ;;  %p2877_p10 = scmp.eq.s32.totalorder %s2257_s16, 1 }
  0x2e   : > { %s152_s27 = sand.u32 1, %s2201_s14   ;;  %s1828_s28 = sshll.u32 %s2205_s15, 6 }
  0x2f   : > { %p2327_p12 = por %p2877_p10, %p36_p1  ;;  %s2333_s29 = sshll.u32 %s152_s27, 2 }
  0x30   : > { %s2338_s22 = scalar_lea.hbm %s2858_s0, %s1828_s28  ;;  %s156_s25 = scalar_lea.vmem [#allocation2], %s2333_s29 }
  0x31   : > { %s2878_s21 = scalar_select %p2327_p12, 1, 0 }
  0x32   : > { %s164_s26 = sshll.u32 %s156_s25, 4  ;;  %p2341_p11 = pnand %p1992_p6, %p38_p8  ;;  %s2345_s26 = int_to_ptr.vmem [resolvable:$true] %s164_s26 }
  0x33   : > { %s2350_s7 = scalar_lea.hbm %s2859_s1, %s1828_s28  ;;  %s153_s8 = scalar_lea.sflag [#allocation3], %s152_s27 }
  0x34   : > { %s2071_s9 = scalar_lea.hbm %s2338_s22, 64  ;;  %p2073_p0 = pneg %p2341_p11 }
  0x35   : > { %p2072_p13 = scmp.ne.s32.totalorder %s2338_s22, %s2071_s9  ;;  %s2076_s23 = scalar_lea.hbm %s2858_s0, 128 }
  0x36   : > { %p2077_p7 = scmp.lt.u32.totalorder %s2338_s22, %s2858_s0  ;;  %p2078_p9 = scmp.lt.u32.totalorder %s2076_s23, %s2071_s9 }
  0x37   : > { %p2074_p3 = pnand %p2073_p0, %p2072_p13  ;;  %p2080_p1 = scmp.lt.u32.totalorder %s2071_s9, %s2338_s22 }
  0x38   : > { %p2079_p2 = por %p2078_p9, %p2077_p7 }
  0x39   : > { %p2075_p5 = pneg %p2074_p3 }
  0x3a   : > { %p2081_p4 = por %p2080_p1, %p2079_p2 }
  0x3c   : > { %p2082_p6 = pnand %p2081_p4, %p2075_p5 }
  0x3e   : > { %2085 = shalt.err (!%p2082_p6)
}
  0x3f   : > { %s2086_s27 = scalar_lea.vmem %s2345_s26, 64  ;;  %s2210_s28 = smov [#allocation2]  }
  0x40   : > { %p2087_p8 = scmp.ne.s32.totalorder %s2345_s26, %s2086_s27  ;;  %s2091_s5 = sshll.u32 %s2210_s28, 4  ;;  %s2092_s5 = int_to_ptr.vmem [resolvable:$false] %s2091_s5 }
  0x41   : > { %s2093_s6 = scalar_lea.vmem %s2092_s5, 128  ;;  %p2094_p3 = scmp.lt.s32.totalorder %s2345_s26, %s2092_s5 }
  0x42   : > { %p2089_p10 = pnand %p2087_p8, %p2073_p0  ;;  %p2095_p7 = scmp.lt.s32.totalorder %s2093_s6, %s2086_s27 }
  0x44   : > { %p2090_p13 = pneg %p2089_p10  ;;  %p2096_p9 = por %p2095_p7, %p2094_p3 }
  0x46   : > { %p2097_p2 = pnand %p2096_p9, %p2090_p13 }
  0x48   : > { %2100 = shalt.err (!%p2097_p2)
}
  0x49   : > { %1983 = dma.hbm_to_vmem [thread:$0]  (!%p2341_p11), %s2338_s22, 64, %s2345_s26, %s153_s8  }
  0x4a   : > { %s171_s9 = sand.u32 1, %s2205_s15   ;;  %s175_s10 = scalar_lea.vmem [#allocation5], %s2333_s29 }
  0x4b   : > { %s183_s11 = sshll.u32 %s175_s10, 4  ;;  %s172_s23 = scalar_lea.sflag [#allocation6], %s171_s9  ;;  %s184_s11 = int_to_ptr.vmem [resolvable:$true] %s183_s11 }
  0x4c   : > { %s2101_s30 = scalar_lea.hbm %s2350_s7, 64  ;;  %s2106_s28 = scalar_lea.hbm %s2859_s1, 128 }
  0x4d   : > { %p2102_p5 = scmp.ne.s32.totalorder %s2350_s7, %s2101_s30  ;;  %p2107_p6 = scmp.lt.u32.totalorder %s2350_s7, %s2859_s1 }
  0x4e   : > { %p2108_p8 = scmp.lt.u32.totalorder %s2106_s28, %s2101_s30  ;;  %p2110_p13 = scmp.lt.u32.totalorder %s2101_s30, %s2350_s7 }
  0x4f   : > { %p2104_p1 = pnand %p2102_p5, %p2073_p0 }
  0x50   : > { %p2109_p10 = por %p2108_p8, %p2107_p6 }
  0x51   : > { %p2105_p4 = pneg %p2104_p1 }
  0x52   : > { %p2111_p3 = por %p2110_p13, %p2109_p10 }
  0x54   : > { %p2112_p7 = pnand %p2111_p3, %p2105_p4 }
  0x56   : > { %2115 = shalt.err (!%p2112_p7)
}
  0x57   : > { %s2116_s29 = scalar_lea.vmem %s184_s11, 64  ;;  %s2211_s22 = smov [#allocation5]  }
  0x58   : > { %p2117_p9 = scmp.ne.s32.totalorder %s184_s11, %s2116_s29  ;;  %s2121_s26 = sshll.u32 %s2211_s22, 4  ;;  %s2122_s26 = int_to_ptr.vmem [resolvable:$false] %s2121_s26 }
  0x59   : > { %s2123_s8 = scalar_lea.vmem %s2122_s26, 128  ;;  %p2124_p1 = scmp.lt.s32.totalorder %s184_s11, %s2122_s26 }
  0x5a   : > { %p2119_p2 = pnand %p2117_p9, %p2073_p0  ;;  %p2125_p12 = scmp.lt.s32.totalorder %s2123_s8, %s2116_s29 }
  0x5c   : > { %p2120_p5 = pneg %p2119_p2  ;;  %p2126_p6 = por %p2125_p12, %p2124_p1 }
  0x5e   : > { %p2127_p8 = pnand %p2126_p6, %p2120_p5 }
  0x60   : > { %2130 = shalt.err (!%p2127_p8)
}
  0x61   : > { %1986 = dma.hbm_to_vmem [thread:$0]  (!%p2341_p11), %s2350_s7, 64, %s184_s11, %s172_s23  }
  0x62   : > { %p2880_p4 = scmp.ne.s32.totalorder %s2875_s20, 0 }
  0x63   : > { %s2401_s9 = sand.u32 (!%p2880_p4), 1, %s2197_s13   ;;  %p2881_p0 = scmp.ne.s32.totalorder (!%p2880_p4), %s2873_s18, 0 }
  0x64   : > { %192 = sbr.rel (%p2880_p4) target bundleno = 648 (0x288), region = 32  ;;  %s1755_s10 = sshll.u32 (!%p2880_p4), %s2401_s9, 2 }
  0x65   : > { %s195_s30 = scalar_lea.sflag (!%p2880_p4), [#allocation3], %s2401_s9  ;;  %s198_s25 = scalar_lea.vmem (!%p2880_p4), [#allocation2], %s1755_s10 }
  0x6b   : > { %2176 = dma.done.wait (%p2881_p0), %s195_s30, 64  }
  0x6c   : > { %2178 = vsyncadd (%p2881_p0), %s195_s30, 4294967232  ;;  %s203_s4 = sand.u32 1, %s2257_s16   ;;  %s2410_s20 = scalar_lea.vmem [#allocation5], %s1755_s10 }
  0x6d   : > { %s204_s7 = scalar_lea.sflag [#allocation6], %s203_s4 }
  0x6e   : > { %2180 = dma.done.wait (%p2881_p0), %s204_s7, 64  }
  0x6f   : > { %2182 = vsyncadd (%p2881_p0), %s204_s7, 4294967232  ;;  %p2882_p12 = scmp.eq.s32.totalorder %s2257_s16, 0 }
  0x71   : > { %2184 = dma.done.wait (%p2882_p12), [#allocation6], 256   ;;  %p2883_p11 = pmov %p2882_p12 }
  0x72   : > { %v244_v0 = vlaneseq  ;;  %v2212_v1 = vmov 0.0   ;;  %vm329_vm0 = vcmask 261120   ;;  %v241_v7 = vld [vmem:[%s198_s25] sm:$0xf]  ;;  %v242_v9 = vld [vmem:[#allocation7] sm:$0xff]  ;;  %v243_v10 = vld [vmem:[#allocation7 + $0x8] sm:$0xff] }
  0x73   : > { %2186 = vsyncadd (%p2883_p11), [#allocation6], 4294967040  ;;  %408 = vmatprep.mubr.f32.mxu0 %v2212_v1  ;;  %1000 = vmatprep.mubr.f32.mxu1 %v2212_v1  ;;  %v2435_v15 = vsel %vm329_vm0, %v242_v9, 0  ;;  %v2437_v16 = vsel %vm329_vm0, %v243_v10, 0  ;;  %v2213_v30 = vmov 1.0|1.0  }
  0x74   : > { %v2422_v2 = vshrl.u32 %v244_v0, 7  ;;  %v2454_v23 = vand.u32 4294901760, %v2435_v15  ;;  %v2457_v24 = vand.u32 4294901760, %v2437_v16  ;;  %s1758_s18 = sshll.u32 %s2401_s9, 3  ;;  %s1825_s11 = sshll.u32 %s2257_s16, 7 }
  0x75   : > { %s238_s23 = scalar_lea.vmem [#allocation8], %s1758_s18  ;;  %s2814_s6 = scalar_lea.hbm %s2861_s3, %s1825_s11 }
  0x76   : > { %v2425_v3 = vsub.s32 0, %v2422_v2  ;;  %v255_v4 = vsub.s32 2, %v2422_v2  ;;  %v2429_v5 = vsub.s32 1, %v2422_v2  ;;  %v295_v6 = vsub.s32 3, %v2422_v2  ;;  %s1642_s27 = sshll.u32 %s238_s23, 4  ;;  %s1629_s29 = scalar_lea.sflag [#allocation4], %s2401_s9  ;;  %s2816_s27 = int_to_ptr.vmem [resolvable:$true] %s1642_s27 }
  0x77   : > { %v246_v8 = vadd.s32 8, %v2422_v2  ;;  %v2442_v19 = vadd.s32 16, %v2422_v2  ;;  %v2445_v20 = vadd.s32 24, %v2422_v2  ;;  %s2131_s22 = scalar_lea.vmem %s2816_s27, 128  ;;  %p2907_p13 = scmp.ne.s32.totalorder %s2878_s21, 0 }
  0x78   : > { %v256_v11 = vrot.slane %v241_v7, %v255_v4  ;;  %v296_v12 = vrot.slane %v241_v7, %v295_v6  ;;  %v252_v13 = vrot.slane %v241_v7, %v2425_v3  ;;  %v292_v14 = vrot.slane %v241_v7, %v2429_v5  ;;  %p2132_p10 = scmp.ne.s32.totalorder %s2816_s27, %s2131_s22  ;;  %s2215_s16 = smov [#allocation8]  }
  0x79   : > { %s2135_s26 = sshll.u32 %s2215_s16, 4  ;;  %s2136_s26 = int_to_ptr.vmem [resolvable:$false] %s2135_s26 }
  0x7a   : > { %v264_v17 = vrot.slane %v256_v11, %v2425_v3  ;;  %v304_v18 = vrot.slane %v296_v12, %v2429_v5  ;;  %v2448_v21 = vrot.slane %v252_v13, %v2425_v3  ;;  %v2451_v22 = vrot.slane %v292_v14, %v2429_v5  ;;  %p2133_p3 = pnand %p2132_p10, %p2907_p13  ;;  %s2137_s8 = scalar_lea.vmem %s2136_s26, 256 }
  0x7b   : > { %p2138_p9 = scmp.lt.s32.totalorder %s2816_s27, %s2136_s26  ;;  %p2139_p2 = scmp.lt.s32.totalorder %s2137_s8, %s2131_s22 }
  0x7c   : > { %vm266_vm1 = vcmp.eq.s32.totalorder %v264_v17, %v2422_v2  ;;  %vm268_vm2 = vcmp.eq.s32.totalorder %v264_v17, %v246_v8  ;;  %vm306_vm3 = vcmp.eq.s32.totalorder %v304_v18, %v2422_v2  ;;  %vm308_vm4 = vcmp.eq.s32.totalorder %v304_v18, %v246_v8  ;;  %p2134_p7 = pneg %p2133_p3 }
  0x7d   : > { %v1760_v25 = vsel %vm266_vm1, 1.0, %v2212_v1  ;;  %v1762_v26 = vsel %vm268_vm2, 1.0, %v2212_v1  ;;  %vm2463_vm5 = vmpackc.low %vm268_vm2, %vm266_vm1  ;;  %v1768_v28 = vsel %vm306_vm3, 1.0, %v2212_v1  ;;  %v1770_v29 = vsel %vm308_vm4, 1.0, %v2212_v1  ;;  %p2140_p5 = por %p2139_p2, %p2138_p9 }
  0x7e   : > { %1831 = vmatprep.subr.msk.bf16.mxu0 %vm2463_vm5, %v2213_v30  ;;  %v2472_v31 = vsub.f32 %v1760_v25, %v1760_v25  ;;  %v2474_v32 = vsub.f32 %v1762_v26, %v1762_v26  ;;  %vm2476_vm6 = vmpackc.low %vm308_vm4, %vm306_vm3  ;;  %v2480_v34 = vsub.f32 %v1768_v28, %v1768_v28  ;;  %v2482_v35 = vsub.f32 %v1770_v29, %v1770_v29 }
  0x7f   : > { %1879 = vmatprep.subr.msk.bf16.mxu1 %vm2476_vm6, %v2213_v30  ;;  %vm265_vm7 = vcmp.eq.s32.totalorder %v2448_v21, %v2422_v2  ;;  %vm267_vm8 = vcmp.eq.s32.totalorder %v2448_v21, %v246_v8  ;;  %vm305_vm9 = vcmp.eq.s32.totalorder %v2451_v22, %v2422_v2  ;;  %vm307_vm10 = vcmp.eq.s32.totalorder %v2451_v22, %v246_v8  ;;  %p2141_p1 = pnand %p2140_p5, %p2134_p7 }
  0x80   : > { %v1759_v36 = vsel %vm265_vm7, 1.0, %v2212_v1  ;;  %v1761_v37 = vsel %vm267_vm8, 1.0, %v2212_v1  ;;  %vm2495_vm11 = vmpackc.low %vm267_vm8, %vm265_vm7  ;;  %v1767_v39 = vsel %vm305_vm9, 1.0, %v2212_v1  ;;  %v1769_v40 = vsel %vm307_vm10, 1.0, %v2212_v1 }
  0x81   : > { %1833 = vmatpush1.bf16.msk.msra.mxu0 %vm2495_vm11, %v2213_v30  ;;  %v2504_v41 = vsub.f32 %v1759_v36, %v1759_v36  ;;  %v2506_v42 = vsub.f32 %v1761_v37, %v1761_v37  ;;  %vm2508_vm12 = vmpackc.low %vm307_vm10, %vm305_vm9  ;;  %v2512_v44 = vsub.f32 %v1767_v39, %v1767_v39  ;;  %v2514_v45 = vsub.f32 %v1769_v40, %v1769_v40 }
  0x82   : > { %1881 = vmatpush1.bf16.msk.msra.mxu1 %vm2508_vm12, %v2213_v30  ;;  %vm270_vm13 = vcmp.eq.s32.totalorder %v264_v17, %v2442_v19  ;;  %vm272_vm14 = vcmp.eq.s32.totalorder %v264_v17, %v2445_v20  ;;  %vm310_vm15 = vcmp.eq.s32.totalorder %v304_v18, %v2442_v19  ;;  %vm312_vm0 = vcmp.eq.s32.totalorder %v304_v18, %v2445_v20 }
  0x83   : > { %v439_v46 = vand.u32 4294901760, %v2504_v41  ;;  %v2872_v47 = vand.u32 4294901760, %v2506_v42  ;;  %v2870_v48 = vand.u32 4294901760, %v2512_v44  ;;  %v2867_v49 = vand.u32 4294901760, %v2514_v45  ;;  %vm2527_vm1 = vmpackc.low %vm272_vm14, %vm270_vm13 }
  0x84   : > { %v1764_v51 = vsel %vm270_vm13, 1.0, %v2212_v1  ;;  %v1766_v52 = vsel %vm272_vm14, 1.0, %v2212_v1  ;;  %1835 = vmatprep.subr.msk.bf16.mxu0 %vm2527_vm1, %v2213_v30  ;;  %v1772_v53 = vsel %vm310_vm15, 1.0, %v2212_v1  ;;  %v1774_v54 = vsel %vm312_vm0, 1.0, %v2212_v1  ;;  %vm2538_vm2 = vmpackc.low %vm312_vm0, %vm310_vm15 }
  0x85   : > { %v440_v56 = vsub.f32 %v2504_v41, %v439_v46  ;;  %v452_v57 = vsub.f32 %v2506_v42, %v2872_v47  ;;  %v1032_v58 = vsub.f32 %v2512_v44, %v2870_v48  ;;  %v1044_v59 = vsub.f32 %v2514_v45, %v2867_v49  ;;  %1883 = vmatprep.subr.msk.bf16.mxu1 %vm2538_vm2, %v2213_v30 }
  0x86   : > { %v2557_v60 = vsub.f32 %v1764_v51, %v1764_v51  ;;  %v2559_v61 = vsub.f32 %v1766_v52, %v1766_v52  ;;  %v2561_v62 = vsub.f32 %v1772_v53, %v1772_v53  ;;  %v2563_v63 = vsub.f32 %v1774_v54, %v1774_v54 }
  0x87   : > { %v441_v0 = vand.u32 4294901760, %v440_v56  ;;  %v453_v4 = vand.u32 4294901760, %v452_v57  ;;  %v1033_v6 = vand.u32 4294901760, %v1032_v58  ;;  %v1045_v7 = vand.u32 4294901760, %v1044_v59 }
  0x88   : > { %vm269_vm3 = vcmp.eq.s32.totalorder %v2448_v21, %v2442_v19  ;;  %vm271_vm4 = vcmp.eq.s32.totalorder %v2448_v21, %v2445_v20  ;;  %vm309_vm7 = vcmp.eq.s32.totalorder %v2451_v22, %v2442_v19  ;;  %vm311_vm8 = vcmp.eq.s32.totalorder %v2451_v22, %v2445_v20 }
  0x89   : > { %v1763_v8 = vsel %vm269_vm3, 1.0, %v2212_v1  ;;  %v1765_v9 = vsel %vm271_vm4, 1.0, %v2212_v1  ;;  %vm2575_vm9 = vmpackc.low %vm271_vm4, %vm269_vm3  ;;  %v1771_v11 = vsel %vm309_vm7, 1.0, %v2212_v1  ;;  %v1773_v12 = vsel %vm311_vm8, 1.0, %v2212_v1 }
  0x8a   : > { %1837 = vmatpush1.bf16.msk.msra.mxu0 %vm2575_vm9, %v2213_v30  ;;  %v2584_v13 = vsub.f32 %v1763_v8, %v1763_v8  ;;  %v2586_v14 = vsub.f32 %v1765_v9, %v1765_v9  ;;  %vm2588_vm10 = vmpackc.low %vm311_vm8, %vm309_vm7  ;;  %v2592_v18 = vsub.f32 %v1771_v11, %v1771_v11  ;;  %v2594_v19 = vsub.f32 %v1773_v12, %v1773_v12 }
  0x8b   : > { %1885 = vmatpush1.bf16.msk.msra.mxu1 %vm2588_vm10, %v2213_v30  ;;  %v2601_v20 = vsub.f32 %v2435_v15, %v2454_v23  ;;  %v433_v21 = vand.u32 4294901760, %v2472_v31  ;;  %v445_v22 = vand.u32 4294901760, %v2474_v32  ;;  %v1025_v25 = vand.u32 4294901760, %v2480_v34 }
  0x8c   : > { %v463_v26 = vand.u32 4294901760, %v2584_v13  ;;  %v475_v28 = vand.u32 4294901760, %v2586_v14  ;;  %v1055_v29 = vand.u32 4294901760, %v2592_v18  ;;  %v1067_v36 = vand.u32 4294901760, %v2594_v19 }
  0x8d   : > { %v2611_v37 = vand.u32 4294901760, %v2601_v20  ;;  %v434_v15 = vsub.f32 %v2472_v31, %v433_v21  ;;  %v446_v39 = vsub.f32 %v2474_v32, %v445_v22  ;;  %v1026_v40 = vsub.f32 %v2480_v34, %v1025_v25 }
  0x8e   : > { %v1037_v51 = vand.u32 4294901760, %v2482_v35  ;;  %v1840_v52 = vpack.c.bf16 %v453_v4, %v441_v0  ;;  %v1888_v53 = vpack.c.bf16 %v1045_v7, %v1033_v6  ;;  %v2625_v54 = vsub.f32 %v2437_v16, %v2457_v24 }
  0x8f   : > { %v412_v56 = vsub.f32 %v2601_v20, %v2611_v37  ;;  %v435_v57 = vand.u32 4294901760, %v434_v15  ;;  %v447_v58 = vand.u32 4294901760, %v446_v39  ;;  %v1027_v59 = vand.u32 4294901760, %v1026_v40 }
  0x90   : > { %v1038_v8 = vsub.f32 %v2482_v35, %v1037_v51  ;;  %v2633_v9 = vand.u32 4294901760, %v2625_v54  ;;  %v2866_v0 = vand.u32 4294901760, %v2557_v60  ;;  %v2868_v4 = vand.u32 4294901760, %v2559_v61 }
  0x91   : > { %v413_v6 = vand.u32 4294901760, %v412_v56  ;;  %v1838_v16 = vpack.c.bf16 %v447_v58, %v435_v57  ;;  %v2869_v7 = vand.u32 4294901760, %v2561_v62  ;;  %v2871_v11 = vand.u32 4294901760, %v2563_v63 }
  0x92   : > { %v1039_v12 = vand.u32 4294901760, %v1038_v8  ;;  %v423_v15 = vsub.f32 %v2625_v54, %v2633_v9  ;;  %v458_v39 = vsub.f32 %v2557_v60, %v2866_v0  ;;  %v470_v40 = vsub.f32 %v2559_v61, %v2868_v4 }
  0x93   : > { %414 = vmatmul.mubr.f32.vlgmr.msra.gmra.mrb[0].mxu0 %v413_v6  ;;  %1839 = vmatprep.subr.bf16.mxu0 %v1838_v16  ;;  %v1050_v56 = vsub.f32 %v2561_v62, %v2869_v7  ;;  %v1062_v57 = vsub.f32 %v2563_v63, %v2871_v11  ;;  %v464_v58 = vsub.f32 %v2584_v13, %v463_v26 }
  0x94   : > { %1006 = vmatmul.mubr.f32.vlgmr.msra.gmra.mrb[0].mxu1 %v413_v6  ;;  %v1886_v8 = vpack.c.bf16 %v1039_v12, %v1027_v59  ;;  %1841 = vmatpush1.bf16.msra.mxu0 %v1840_v52  ;;  %v424_v0 = vand.u32 4294901760, %v423_v15  ;;  %v459_v49 = vand.u32 4294901760, %v458_v39  ;;  %v471_v4 = vand.u32 4294901760, %v470_v40 }
  0x95   : > { %419 = vmatprep.mubr.f32.mxu0 %v2212_v1  ;;  %1011 = vmatprep.mubr.f32.mxu1 %v2212_v1  ;;  %v1051_v16 = vand.u32 4294901760, %v1050_v56  ;;  %v1063_v7 = vand.u32 4294901760, %v1062_v57  ;;  %v465_v48 = vand.u32 4294901760, %v464_v58  ;;  %v476_v11 = vsub.f32 %v2586_v14, %v475_v28 }
  0x96   : > { %1887 = vmatprep.subr.bf16.mxu1 %v1886_v8  ;;  %v1842_v47 = vpack.c.bf16 %v471_v4, %v459_v49  ;;  %v1056_v52 = vsub.f32 %v2592_v18, %v1055_v29  ;;  %v1068_v59 = vsub.f32 %v2594_v19, %v1067_v36  ;;  %v1846_v40 = vpack.c.bf16 %v2474_v32, %v2472_v31 }
  0x97   : > { %1889 = vmatpush1.bf16.msra.mxu1 %v1888_v53  ;;  %425 = vmatmul.mubr.f32.gmra.mrb[2].mxu0 %v424_v0  ;;  %v1890_v6 = vpack.c.bf16 %v1063_v7, %v1051_v16  ;;  %v477_v12 = vand.u32 4294901760, %v476_v11  ;;  %v1894_v4 = vpack.c.bf16 %v2482_v35, %v2480_v34  ;;  %v1896_v53 = vpack.c.bf16 %v2514_v45, %v2512_v44 }
  0x98   : > { %1843 = vmatprep.subr.bf16.mxu0 %v1842_v47  ;;  %1017 = vmatmul.mubr.f32.gmra.mrb[2].mxu1 %v424_v0  ;;  %v1057_v15 = vand.u32 4294901760, %v1056_v52  ;;  %v1069_v39 = vand.u32 4294901760, %v1068_v59  ;;  %v1848_v47 = vpack.c.bf16 %v2506_v42, %v2504_v41  ;;  %v1898_v0 = vpack.c.bf16 %v2563_v63, %v2561_v62 }
  0x99   : > { %1891 = vmatprep.subr.bf16.mxu1 %v1890_v6  ;;  %v1844_v49 = vpack.c.bf16 %v477_v12, %v465_v48  ;;  %535 = vmatprep.mubr.f32.mxu0 %v2212_v1  ;;  %v1850_v48 = vpack.c.bf16 %v2559_v61, %v2557_v60  ;;  %v1852_v7 = vpack.c.bf16 %v2586_v14, %v2584_v13  ;;  %v2900_v31 = vand.u32 4294901760, %v2506_v42 }
  0x9a   : > { %v1892_v56 = vpack.c.bf16 %v1069_v39, %v1057_v15  ;;  %1127 = vmatprep.mubr.f32.mxu1 %v2212_v1  ;;  %v1900_v11 = vpack.c.bf16 %v2594_v19, %v2592_v18  ;;  %v1910_v57 = vpack.c.bf16 %v1037_v51, %v1025_v25  ;;  %v2901_v34 = vand.u32 4294901760, %v2512_v44 }
  0x9b   : > { %1845 = vmatpush1.bf16.msra.mxu0 %v1844_v49  ;;  %v1864_v32 = vpack.c.bf16 %v2900_v31, %v439_v46  ;;  %v2902_v35 = vand.u32 4294901760, %v2514_v45  ;;  %v2904_v41 = vand.u32 4294901760, %v2559_v61  ;;  %v2905_v46 = vand.u32 4294901760, %v2561_v62 }
  0x9c   : > { %1893 = vmatpush1.bf16.msra.mxu1 %v1892_v56  ;;  %1847 = vmatprep.subr.bf16.mxu0 %v1846_v40  ;;  %v2906_v25 = vand.u32 4294901760, %v2563_v63  ;;  %v1868_v44 = vpack.c.bf16 %v475_v28, %v463_v26  ;;  %v1916_v45 = vpack.c.bf16 %v1067_v36, %v1055_v29  ;;  %v2214_v40 = vmov 1966171168  }
  0x9d   : > { %1895 = vmatprep.subr.bf16.mxu1 %v1894_v4  ;;  %v1568_v49 = vunpack.c.l.s4 %v2214_v40 }
  0x9e   : > { %537 = vmatmul.mubr.f32.vlgmr.msra.gmra.mrb[0].mxu0 %v2454_v23  ;;  %v1914_v51 = vpack.c.bf16 %v2906_v25, %v2905_v46 }
  0x9f   : > { %1129 = vmatmul.mubr.f32.vlgmr.msra.gmra.mrb[0].mxu1 %v2454_v23  ;;  %1849 = vmatpush1.bf16.msra.mxu0 %v1848_v47  ;;  %v1569_v4 = vunpack.c.0.s8 %v1568_v49 }
  0xa0   : > { %1897 = vmatpush1.bf16.msra.mxu1 %v1896_v53  ;;  %542 = vmatprep.mubr.f32.mxu0 %v2212_v1 }
  0xa1   : > { %1134 = vmatprep.mubr.f32.mxu1 %v2212_v1  ;;  %1851 = vmatprep.subr.bf16.mxu0 %v1850_v48 }
  0xa2   : > { %544 = vmatmul.mubr.f32.gmra.mrb[2].mxu0 %v2457_v24  ;;  %1899 = vmatprep.subr.bf16.mxu1 %v1898_v0 }
  0xa3   : > { %1136 = vmatmul.mubr.f32.gmra.mrb[2].mxu1 %v2457_v24  ;;  %1853 = vmatpush1.bf16.msra.mxu0 %v1852_v7  ;;  %v1572_v7 = vsub.s32 %v1569_v4, %v2422_v2  ;;  %v1823_v2 = vld [vmem:[%s2410_s20 + $0x1] ss:$2 sm:$0x3] }
  0xa4   : > { %1901 = vmatpush1.bf16.msra.mxu1 %v1900_v11  ;;  %630 = vmatprep.mubr.f32.mxu0 %v2212_v1 }
  0xa5   : > { %1222 = vmatprep.mubr.f32.mxu1 %v2212_v1  ;;  %1855 = vmatprep.subr.msk.bf16.mxu0 %vm2463_vm5, %v2213_v30 }
  0xa6   : > { %633 = vmatmul.mubr.f32.vlgmr.msra.gmra.mrb[0].mxu0 %v2601_v20  ;;  %1903 = vmatprep.subr.msk.bf16.mxu1 %vm2476_vm6, %v2213_v30 }
  0xa7   : > { %1225 = vmatmul.mubr.f32.vlgmr.msra.gmra.mrb[0].mxu1 %v2601_v20  ;;  %1857 = vmatpush1.bf16.msk.msra.mxu0 %vm2495_vm11, %v2213_v30  ;;  %v1862_v20 = vpack.c.bf16 %v445_v22, %v433_v21  ;;  %v1912_v21 = vpack.c.bf16 %v2902_v35, %v2901_v34  ;;  %v2903_v22 = vand.u32 4294901760, %v2557_v60  ;;  %v1558_v35 = vld [vmem:[%s2410_s20] ss:$2 sm:$0x3] }
  0xa8   : > { %1905 = vmatpush1.bf16.msk.msra.mxu1 %vm2508_vm12, %v2213_v30  ;;  %638 = vmatprep.mubr.f32.mxu0 %v2212_v1 }
  0xa9   : > { %1230 = vmatprep.mubr.f32.mxu1 %v2212_v1  ;;  %1859 = vmatprep.subr.msk.bf16.mxu0 %vm2527_vm1, %v2213_v30  ;;  %v1866_v42 = vpack.c.bf16 %v2904_v41, %v2903_v22 }
  0xaa   : > { %641 = vmatmul.mubr.f32.gmra.mrb[2].mxu0 %v2625_v54  ;;  %1907 = vmatprep.subr.msk.bf16.mxu1 %vm2538_vm2, %v2213_v30 }
  0xab   : > { %1233 = vmatmul.mubr.f32.gmra.mrb[2].mxu1 %v2625_v54  ;;  %1861 = vmatpush1.bf16.msk.msra.mxu0 %vm2575_vm9, %v2213_v30 }
  0xac   : > { %1909 = vmatpush1.bf16.msk.msra.mxu1 %vm2588_vm10, %v2213_v30  ;;  %719 = vmatprep.mubr.f32.mxu0 %v2212_v1 }
  0xad   : > { %1311 = vmatprep.mubr.f32.mxu1 %v2212_v1  ;;  %1863 = vmatprep.subr.bf16.mxu0 %v1862_v20 }
  0xae   : > { %723 = vmatmul.mubr.f32.vlgmr.msra.gmra.mrb[0].mxu0 %v2611_v37  ;;  %1911 = vmatprep.subr.bf16.mxu1 %v1910_v57 }
  0xaf   : > { %1315 = vmatmul.mubr.f32.vlgmr.msra.gmra.mrb[0].mxu1 %v2611_v37  ;;  %1865 = vmatpush1.bf16.msra.mxu0 %v1864_v32 }
  0xb0   : > { %1913 = vmatpush1.bf16.msra.mxu1 %v1912_v21  ;;  %728 = vmatprep.mubr.f32.mxu0 %v2212_v1 }
  0xb1   : > { %1320 = vmatprep.mubr.f32.mxu1 %v2212_v1  ;;  %1867 = vmatprep.subr.bf16.mxu0 %v1866_v42 }
  0xb2   : > { %732 = vmatmul.mubr.f32.gmra.mrb[2].mxu0 %v2633_v9  ;;  %1915 = vmatprep.subr.bf16.mxu1 %v1914_v51 }
  0xb3   : > { %1324 = vmatmul.mubr.f32.gmra.mrb[2].mxu1 %v2633_v9  ;;  %1869 = vmatpush1.bf16.msra.mxu0 %v1868_v44 }
  0xb4   : > { %1917 = vmatpush1.bf16.msra.mxu1 %v1916_v45  ;;  %826 = vmatprep.mubr.f32.mxu0 %v2212_v1 }
  0xb5   : > { %1418 = vmatprep.mubr.f32.mxu1 %v2212_v1  ;;  %1871 = vmatprep.subr.msk.bf16.mxu0 %vm2463_vm5, %v2213_v30 }
  0xb6   : > { %828 = vmatmul.mubr.f32.vlgmr.msra.gmra.mrb[0].mxu0 %v2454_v23  ;;  %1919 = vmatprep.subr.msk.bf16.mxu1 %vm2476_vm6, %v2213_v30 }
  0xb7   : > { %1420 = vmatmul.mubr.f32.vlgmr.msra.gmra.mrb[0].mxu1 %v2454_v23  ;;  %1873 = vmatpush1.bf16.msk.msra.mxu0 %vm2495_vm11, %v2213_v30  ;;  %vm1561_vm11 = vcmp.gt.f32.partialorder %v1558_v35, 0.5 }
  0xb8   : > { %1921 = vmatpush1.bf16.msk.msra.mxu1 %vm2508_vm12, %v2213_v30  ;;  %833 = vmatprep.mubr.f32.mxu0 %v2212_v1  ;;  %vm1617_vm12 = vcmask 1040384  }
  0xb9   : > { %1425 = vmatprep.mubr.f32.mxu1 %v2212_v1  ;;  %1875 = vmatprep.subr.msk.bf16.mxu0 %vm2527_vm1, %v2213_v30 }
  0xba   : > { %835 = vmatmul.mubr.f32.gmra.mrb[2].mxu0 %v2457_v24  ;;  %1923 = vmatprep.subr.msk.bf16.mxu1 %vm2538_vm2, %v2213_v30 }
  0xbb   : > { %1427 = vmatmul.mubr.f32.gmra.mrb[2].mxu1 %v2457_v24  ;;  %1877 = vmatpush1.bf16.msk.msra.mxu0 %vm2575_vm9, %v2213_v30 }
  0xbc   : > { %1925 = vmatpush1.bf16.msk.msra.mxu1 %vm2588_vm10, %v2213_v30  ;;  %913 = vmatprep.mubr.f32.mxu0 %v2212_v1 }
  0xbd   : > { %1505 = vmatprep.mubr.f32.mxu1 %v2212_v1 }
  0xbe   : > { %915 = vmatmul.mubr.f32.vlgmr.msra.gmra.mrb[0].mxu0 %v2454_v23 }
  0xbf   : > { %1507 = vmatmul.mubr.f32.vlgmr.msra.gmra.mrb[0].mxu1 %v2454_v23  ;;  %920 = vmatprep.mubr.f32.mxu0 %v2212_v1 }
  0xc0   : > { %1512 = vmatprep.mubr.f32.mxu1 %v2212_v1 }
  0xc2   : > { %922 = vmatmul.mubr.f32.gmra.mrb[2].mxu0 %v2457_v24 }
  0xc3   : > { %1514 = vmatmul.mubr.f32.gmra.mrb[2].mxu1 %v2457_v24 }
 0x191   : > { %v916_v27 = vpop.f32.mrb[0].mxu0 }
 0x192   : > { %v1508_v33 = vpop.f32.mrb[0].mxu1  ;;  %v918_v38 = vpop.f32.mrb[1].mxu0 }
 0x193   : > { %v1520_v30 = vmul.f32 %v1508_v33, %v916_v27  ;;  %v1510_v43 = vpop.f32.mrb[1].mxu1 }
 0x194   : > { %v1521_v50 = vmul.f32 %v1510_v43, %v918_v38 }
 0x195   : > { %v923_v55 = vpop.f32.mrb[2].mxu0 }
 0x196   : > { %v1515_v60 = vpop.f32.mrb[2].mxu1  ;;  %v925_v61 = vpop.f32.mrb[3].mxu0 }
 0x197   : > { %v1522_v62 = vmul.f32 %v1515_v60, %v923_v55  ;;  %v1517_v63 = vpop.f32.mrb[3].mxu1 }
 0x198   : > { %v1523_v23 = vmul.f32 %v1517_v63, %v925_v61 }
 0x199   : > { %v1524_v10 = vadd.f32 %v1522_v62, %v1520_v30 }
 0x19a   : > { %v1531_v13 = vadd.f32 %v1523_v23, %v1521_v50 }
 0x19b   : > { %v1525_v14 = vrot.slane %v1524_v10, 4 }
 0x19c   : > { %v1532_v1 = vrot.slane %v1531_v13, 4 }
 0x19d   : > { %v1526_v17 = vadd.f32 %v1525_v14, %v1524_v10 }
 0x19e   : > { %v1533_v18 = vadd.f32 %v1532_v1, %v1531_v13 }
 0x19f   : > { %v1527_v19 = vrot.slane %v1526_v17, 2 }
 0x1a0   : > { %v1534_v24 = vrot.slane %v1533_v18, 2 }
 0x1a1   : > { %v1528_v26 = vadd.f32 %v1527_v19, %v1526_v17 }
 0x1a2   : > { %v1535_v28 = vadd.f32 %v1534_v24, %v1533_v18 }
 0x1a3   : > { %v1529_v29 = vrot.slane %v1528_v26, 1 }
 0x1a4   : > { %v1536_v36 = vrot.slane %v1535_v28, 1 }
 0x1a5   : > { %v1530_v37 = vadd.f32 %v1529_v29, %v1528_v26 }
 0x1a6   : > { %v1537_v54 = vadd.f32 %v1536_v36, %v1535_v28 }
 0x1a7   : > { %v1538_v9 = vand.u32 2147483647, %v1530_v37  ;;  %vm1546_vm5 = vcmp.ge.f32.partialorder %v1530_v37, 0.0 }
 0x1a8   : > { %v1539_v58 = vand.u32 2147483647, %v1537_v54  ;;  %vm1547_vm6 = vcmp.ge.f32.partialorder %v1537_v54, 0.0 }
 0x1a9   : > { %v1540_v8 = vsub.f32 0.0, %v1538_v9 }
 0x1aa   : > { %v1541_v16 = vsub.f32 0.0, %v1539_v58 }
 0x1ab   : > { %v1542_v52 = vmul.f32 1.442695, %v1540_v8 }
 0x1ac   : > { %v1544_v59 = vmul.f32 1.442695, %v1541_v16 }
 0x1ad   : > { %2033 = vpow2.f32 %v1542_v52 }
 0x1ae   : > { %2035 = vpow2.f32 %v1544_v59 }
 0x1b7   : > { %v2034_v6 = vpop.eup %2033 }
 0x1b8   : > { %v2036_v12 = vpop.eup %2035  ;;  %v1548_v15 = vadd.f32 1.0, %v2034_v6 }
 0x1b9   : > { %v1549_v39 = vadd.f32 1.0, %v2036_v12 }
 0x1ba   : > { %2037 = vrcp.f32 %v1548_v15 }
 0x1bb   : > { %2039 = vrcp.f32 %v1549_v39 }
 0x1c4   : > { %v2038_v56 = vpop.eup %2037 }
 0x1c5   : > { %v2040_v47 = vpop.eup %2039  ;;  %v1554_v53 = vmul.f32 %v2038_v56, %v2034_v6 }
 0x1c6   : > { %v1555_v48 = vmul.f32 %v2040_v47, %v2036_v12 }
 0x1c7   : > { %v1556_v0 = vsel %vm1546_vm5, %v2038_v56, %v1554_v53 }
 0x1c8   : > { %v1562_v11 = vsub.f32 1.0, %v1556_v0  ;;  %v1557_v20 = vsel %vm1547_vm6, %v2040_v47, %v1555_v48 }
 0x1c9   : > { %v1563_v57 = vsub.f32 1.0, %v1557_v20  ;;  %v1566_v31 = vcombine.low %v1556_v0, %v1557_v20 }
 0x1cb   : > { %v1573_v32 = vrot.slane %v1566_v31, %v1572_v7  ;;  %v1584_v34 = vcombine.low %v1562_v11, %v1563_v57 }
 0x1cd   : > { %v1591_v21 = vrot.slane %v1584_v34, %v1572_v7  ;;  %v1580_v22 = vrot.slane %v1573_v32, %v1572_v7 }
 0x1cf   : > { %v1598_v41 = vrot.slane %v1591_v21, %v1572_v7 }
 0x1d1   : > { %v1600_v42 = vsel %vm1561_vm11, %v1580_v22, %v1598_v41 }
 0x1d2   : > { %v1601_v46 = vadd.f32 1e-15, %v1600_v42 }
 0x1d4   : > { %2041 = vlog2.f32 %v1601_v46 }
 0x1de   : > { %v2042_v25 = vpop.eup %2041 }
 0x1df   : > { %v1603_v51 = vmul.f32 0.6931472, %v2042_v25 }
 0x1e1   : > { %v1604_v44 = vsub.f32 0.0, %v1603_v51 }
 0x1e3   : > { %v1605_v45 = vmul.f32 %v1823_v2, %v1604_v44 }
 0x1e5   : > { %v1610_v27 = vrot.slane %v1605_v45, %v2425_v3  ;;  %v1614_v33 = vrot.slane %v1605_v45, %v2429_v5 }
 0x1e7   : > { %v1618_v38 = vsel %vm1617_vm12, %v1610_v27, 0.0  ;;  %v1619_v30 = vsel %vm1617_vm12, %v1614_v33, 0.0 }
 0x1e8   : > { %v1620_v43 = vadd.f32 %v1619_v30, %v1618_v38 }
 0x1ea   : > { %1621 = vadd.xlane.f32.xlu0 %v1620_v43 }
 0x277   : > { %v1622_v50 = vpop.xlane.xlu0 %1621 }
 0x278   : > { %v1626_v55 = vrot.slane %v1622_v50, %v2425_v3 }
 0x27a   : > { %1627 = vst [vmem:[%s238_s23] sm:$0xff] %v1626_v55 }
 0x27b   : > { %2144 = shalt.err (!%p2141_p1)
}
 0x27c   : > { %s2145_s9 = scalar_lea.hbm %s2814_s6, 128  ;;  %s2149_s25 = scalar_lea.hbm %s2861_s3, 256 }
 0x27d   : > { %p2146_p6 = scmp.ne.s32.totalorder %s2814_s6, %s2145_s9  ;;  %p2150_p0 = scmp.lt.u32.totalorder %s2814_s6, %s2861_s3 }
 0x27e   : > { %p2151_p12 = scmp.lt.u32.totalorder %s2149_s25, %s2145_s9  ;;  %p2153_p10 = scmp.lt.u32.totalorder %s2145_s9, %s2814_s6 }
 0x27f   : > { %p2147_p8 = pnand %p2146_p6, %p2907_p13 }
 0x280   : > { %p2152_p11 = por %p2151_p12, %p2150_p0 }
 0x281   : > { %p2148_p4 = pneg %p2147_p8 }
 0x282   : > { %p2154_p3 = por %p2153_p10, %p2152_p11 }
 0x284   : > { %p2155_p7 = pnand %p2154_p3, %p2148_p4 }
 0x286   : > { %2158 = shalt.err (!%p2155_p7)
}
 0x287   : > { %1974 = dma.vmem_to_hbm [thread:$0]  (%p2907_p13), %s2816_s27, 128, %s2814_s6, %s1629_s29  }
 0x288 PF: > { %s1654_s20 = sand.u32 1, %s2193_s12   ;;  %p2908_p9 = scmp.ne.s32.totalorder %s2874_s19, 0 }
 0x289   : > { %p2909_p2 = scmp.ge.s32.totalorder %s2205_s15, 2  ;;  %s1655_s18 = scalar_lea.sflag [#allocation4], %s1654_s20 }
 0x28b   : > { %p1988_p5 = pnand %p2909_p2, %p2908_p9 }
 0x28d   : > { %2188 = dma.done.wait (!%p1988_p5), %s1655_s18, 128  }
 0x28e   : > { %2190 = vsyncadd (!%p1988_p5), %s1655_s18, 4294967168  ;;  %p19_p1 = scmp.ge.s32.totalorder %s2292_s24, 4   ;;  %s2910_s12 = smov %s2197_s13 }
 0x28f   : > { %s2911_s13 = smov %s2201_s14  ;;  %s2912_s14 = smov %s2323_s17 }
 0x290   : > { %s2913_s15 = smov %s2292_s24  ;;  %21 = sbr.rel (!%p19_p1) target bundleno = 7 (0x7), region = 95 }
 0x297   :  { %1660 = vsyncpa [#allocation3], 1 }
 0x298   :  { %1662 = vsyncpa [#allocation3 + $0x1], 1 }
 0x299   :  { %1663 = vsyncpa [#allocation6], 1 }
 0x29a   :  { %1665 = vsyncpa [#allocation6 + $0x1], 1 }
 0x29b   :  { %1666 = vsyncpa [#allocation4], 1 }
 0x29c   :  { %1668 = vsyncpa [#allocation4 + $0x1], 1 }

</bundles_post_ra>
